<compile_context>
chip_gen: v6e
topology: v6e:2x2x1
jax: 0.10.0
libtpu: 0.0.40
codegen_flags: <defaults>
</compile_context>

<pallas_src>
import functools

import jax
import jax.numpy as jnp
from jax.experimental import pallas as pl
from jax.experimental.pallas import tpu as pltpu

LANES = 128          # lane width (last dim)
MAX_TILE_ROWS = 1024 # (1024, 128) f32 = 512 KiB per input block
NUM_CORES = 2        # leading "parallel" grid axis (v7x megacore); harmless elsewhere
ACC_ROWS = 8         # vreg-shaped accumulator sublanes


def _smape_kernel(y_ref, yh_ref, out_ref, *, n, block_rows, blocks_per_core):
    c = pl.program_id(0)  # core-sharded ("parallel") axis
    i = pl.program_id(1)  # sequential reduction ("arbitrary") axis

    # Zero this core's resident accumulator block on its first step.
    @pl.when(i == 0)
    def _():
        out_ref[...] = jnp.zeros_like(out_ref)

    y = y_ref[...].astype(jnp.float32)
    yh = yh_ref[...].astype(jnp.float32)

    delta = jnp.abs(y - yh)               # |y - y_hat|
    scale = jnp.abs(y) + jnp.abs(yh)      # |y| + |y_hat|
    r = delta / scale

    # Logical (unclamped) block id -> flat element indices for the tail mask.
    # Zeroes out: padded lanes, garbage rows of a partial block, and any
    # duplicated block read by a core with no remaining work.
    # (int32 is fine for < 2**31 elements.)
    b = c * blocks_per_core + i
    row_ids = jax.lax.broadcasted_iota(jnp.int32, (block_rows, LANES), 0)
    lane_ids = jax.lax.broadcasted_iota(jnp.int32, (block_rows, LANES), 1)
    flat_idx = (b * block_rows + row_ids) * LANES + lane_ids
    valid = flat_idx < n

    # torch.nan_to_num(nan=0, posinf=0, neginf=0) + out-of-range mask.
    r = jnp.where(jnp.isfinite(r) & valid, r, 0.0)

    # Fold (block_rows, 128) -> (8, 128) with pure VPU adds and accumulate
    # into the resident output block (no per-step XLU reduce-to-scalar).
    out_ref[...] += jnp.sum(
        r.reshape(block_rows // ACC_ROWS, ACC_ROWS, LANES), axis=0)


def smape_loss(y, y_hat):
    """Pallas TPU implementation of SMAPELoss.forward (returns f32 scalar)."""
    assert y.shape == y_hat.shape
    n = int(y.size)
    assert n > 0

    yf = jnp.ravel(y)
    yhf = jnp.ravel(y_hat)

    # Pad only when the element count is not lane-aligned; the padded tail is
    # masked in-kernel, so its value is irrelevant.  Inputs keep their native
    # dtype (sub-f32 inputs move half the HBM bytes; cast happens in-kernel).
    rem = n % LANES
    if rem:
        yf = jnp.pad(yf, (0, LANES - rem))
        yhf = jnp.pad(yhf, (0, LANES - rem))

    rows = yf.size // LANES
    y2 = yf.reshape(rows, LANES)
    yh2 = yhf.reshape(rows, LANES)

    # Big blocks for DMA efficiency, capped (and 8-aligned) for small inputs.
    block_rows = min(MAX_TILE_ROWS, ((rows + ACC_ROWS - 1) // ACC_ROWS) * ACC_ROWS)
    num_blocks = pl.cdiv(rows, block_rows)
    blocks_per_core = pl.cdiv(num_blocks, NUM_CORES)

    def in_index_map(c, i):
        # Clamp so the DMA window stays in bounds; the kernel's flat-index
        # mask zeroes any duplicated / out-of-range contribution.
        return (jnp.minimum(c * blocks_per_core + i, num_blocks - 1), 0)

    partials = pl.pallas_call(
        functools.partial(_smape_kernel, n=n, block_rows=block_rows,
                          blocks_per_core=blocks_per_core),
        out_shape=jax.ShapeDtypeStruct((NUM_CORES * ACC_ROWS, LANES),
                                       jnp.float32),
        grid_spec=pltpu.PrefetchScalarGridSpec(
            num_scalar_prefetch=0,
            grid=(NUM_CORES, blocks_per_core),
            in_specs=[
                pl.BlockSpec((block_rows, LANES), in_index_map),
                pl.BlockSpec((block_rows, LANES), in_index_map),
            ],
            out_specs=pl.BlockSpec((ACC_ROWS, LANES), lambda c, i: (c, 0)),
        ),
        compiler_params=pltpu.CompilerParams(
            dimension_semantics=("parallel", "arbitrary"),
            vmem_limit_bytes=32 * 1024 * 1024,
        ),
    )(y2, yh2)

    # Single small final reduce + 2/n scaling outside the kernel.
    return (jnp.sum(partials) * (2.0 / n)).astype(jnp.float32)


def _smape_ref(y, y_hat):
    y = y.astype(jnp.float32)
    y_hat = y_hat.astype(jnp.float32)
    r = jnp.abs(y - y_hat) / (jnp.abs(y) + jnp.abs(y_hat))
    r = jnp.where(jnp.isfinite(r), r, 0.0)
    return 2.0 * jnp.mean(r)


if __name__ == "__main__":
    key = jax.random.PRNGKey(0)
    k1, k2 = jax.random.split(key)
    # small shapes consistent with a generic forecasting target (N, C, H, W)
    y = jax.random.normal(k1, (2, 4, 16, 16), dtype=jnp.float32)
    y_hat = jax.random.normal(k2, (2, 4, 16, 16), dtype=jnp.float32)
    # inject exact zeros in both so the 0/0 -> nan -> 0 path is exercised
    y = y.at[0, 0, 0, :4].set(0.0)
    y_hat = y_hat.at[0, 0, 0, :4].set(0.0)

    out = smape_loss(y, y_hat)
    out = jax.block_until_ready(out)

    ref = _smape_ref(y, y_hat)
    assert jnp.allclose(out, ref, atol=1e-6, rtol=1e-6), (out, ref)
    print("KERNEL_OK")
</pallas_src>

<mosaic_0001>
module attributes {stable_mosaic.version = 11 : i64} {
  func.func @_smape_kernel(%arg0: i32, %arg1: i32, %arg2: memref<16x128xf32, #tpu.memory_space<vmem>>, %arg3: memref<16x128xf32, #tpu.memory_space<vmem>>, %arg4: memref<8x128xf32, #tpu.memory_space<vmem>>) attributes {dimension_semantics = [#tpu.dimension_semantics<parallel>, #tpu.dimension_semantics<arbitrary>], iteration_bounds = array<i64: 2, 1>, scalar_prefetch = 0 : i64, scratch_operands = 0 : i64, tpu.core_type = #tpu.core_type<tc>, window_params = [{transform_indices = @transform_0, window_bounds = array<i64: 16, 128>}, {transform_indices = @transform_1, window_bounds = array<i64: 16, 128>}, {transform_indices = @transform_2, window_bounds = array<i64: 8, 128>}]} {
    %c0_i32 = arith.constant 0 : i32
    %0 = arith.cmpi eq, %arg1, %c0_i32 : i32
    %1 = arith.extui %0 : i1 to i32
    %c0_i32_0 = arith.constant 0 : i32
    %2 = arith.cmpi ne, %1, %c0_i32_0 : i32
    scf.if %2 {
      %cst_10 = arith.constant 0.000000e+00 : f32
      %33 = vector.broadcast %cst_10 : f32 to vector<8x128xf32>
      %c0_11 = arith.constant 0 : index
      %c0_12 = arith.constant 0 : index
      %34 = vector.load %arg4[%c0_11, %c0_12] : memref<8x128xf32, #tpu.memory_space<vmem>>, vector<8x128xf32>
      tpu.vector_store %arg4[%c0_11, %c0_12], %33 {strides = array<i32>} : memref<8x128xf32, #tpu.memory_space<vmem>>, vector<8x128xf32>,
    } else {
    }
    %c0 = arith.constant 0 : index
    %c0_1 = arith.constant 0 : index
    %3 = vector.load %arg2[%c0, %c0_1] : memref<16x128xf32, #tpu.memory_space<vmem>>, vector<16x128xf32>
    %c0_2 = arith.constant 0 : index
    %c0_3 = arith.constant 0 : index
    %4 = vector.load %arg3[%c0_2, %c0_3] : memref<16x128xf32, #tpu.memory_space<vmem>>, vector<16x128xf32>
    %5 = arith.subf %3, %4 : vector<16x128xf32>
    %6 = math.absf %5 : vector<16x128xf32>
    %7 = math.absf %3 : vector<16x128xf32>
    %8 = math.absf %4 : vector<16x128xf32>
    %9 = arith.addf %7, %8 : vector<16x128xf32>
    %10 = arith.divf %6, %9 : vector<16x128xf32>
    %c1_i32 = arith.constant 1 : i32
    %11 = arith.muli %arg0, %c1_i32 : i32
    %12 = arith.addi %11, %arg1 : i32
    %13 = tpu.iota {dimensions = array<i32: 0>} : vector<16x128xi32>
    %14 = tpu.iota {dimensions = array<i32: 1>} : vector<16x128xi32>
    %c16_i32 = arith.constant 16 : i32
    %15 = arith.muli %12, %c16_i32 : i32
    %16 = vector.broadcast %15 : i32 to vector<16x128xi32>
    %17 = arith.addi %16, %13 : vector<16x128xi32>
    %c128_i32 = arith.constant 128 : i32
    %18 = vector.broadcast %c128_i32 : i32 to vector<16x128xi32>
    %19 = arith.muli %17, %18 : vector<16x128xi32>
    %20 = arith.addi %19, %14 : vector<16x128xi32>
    %c2048_i32 = arith.constant 2048 : i32
    %21 = vector.broadcast %c2048_i32 : i32 to vector<16x128xi32>
    %22 = arith.cmpi slt, %20, %21 : vector<16x128xi32>
    %23 = tpu.weird %10 : vector<16x128xf32> -> vector<16x128xi1>
    %cst = arith.constant dense<true> : vector<16x128xi1>
    %24 = arith.xori %23, %cst : vector<16x128xi1>
    %25 = arith.andi %24, %22 : vector<16x128xi1>
    %cst_4 = arith.constant 0.000000e+00 : f32
    %26 = vector.broadcast %cst_4 : f32 to vector<16x128xf32>
    %27 = arith.select %25, %10, %26 : vector<16x128xi1>, vector<16x128xf32>
    %c0_5 = arith.constant 0 : index
    %c0_6 = arith.constant 0 : index
    %28 = vector.load %arg4[%c0_5, %c0_6] : memref<8x128xf32, #tpu.memory_space<vmem>>, vector<8x128xf32>
    %29 = vector.shape_cast %27 : vector<16x128xf32> to vector<2x8x128xf32>
    %cst_7 = arith.constant dense<0.000000e+00> : vector<8x128xf32>
    %30 = vector.multi_reduction <add>, %29, %cst_7 [0] : vector<2x8x128xf32> to vector<8x128xf32>
    %31 = arith.addf %28, %30 : vector<8x128xf32>
    %c0_8 = arith.constant 0 : index
    %c0_9 = arith.constant 0 : index
    %32 = vector.load %arg4[%c0_8, %c0_9] : memref<8x128xf32, #tpu.memory_space<vmem>>, vector<8x128xf32>
    tpu.vector_store %arg4[%c0_8, %c0_9], %31 {strides = array<i32>} : memref<8x128xf32, #tpu.memory_space<vmem>>, vector<8x128xf32>,
    return
  }
  func.func @transform_0(%arg0: i32, %arg1: i32) -> (i32, i32) {
    %c1_i32 = arith.constant 1 : i32
    %0 = arith.muli %arg0, %c1_i32 : i32
    %1 = arith.addi %0, %arg1 : i32
    %c0_i32 = arith.constant 0 : i32
    %2 = arith.minsi %1, %c0_i32 : i32
    %c0_i32_0 = arith.constant 0 : i32
    %c0_i32_1 = arith.constant 0 : i32
    return %2, %c0_i32_0 : i32, i32
  }
  func.func @transform_1(%arg0: i32, %arg1: i32) -> (i32, i32) {
    %c1_i32 = arith.constant 1 : i32
    %0 = arith.muli %arg0, %c1_i32 : i32
    %1 = arith.addi %0, %arg1 : i32
    %c0_i32 = arith.constant 0 : i32
    %2 = arith.minsi %1, %c0_i32 : i32
    %c0_i32_0 = arith.constant 0 : i32
    %c0_i32_1 = arith.constant 0 : i32
    return %2, %c0_i32_0 : i32, i32
  }
  func.func @transform_2(%arg0: i32, %arg1: i32) -> (i32, i32) {
    %c0_i32 = arith.constant 0 : i32
    %c0_i32_0 = arith.constant 0 : i32
    return %arg0, %c0_i32 : i32, i32
  }
}

</mosaic_0001>

<bundles_post_ra>
// kernel: tpu_custom_call.1
= control target key start
LH: loop header
LB: loop body
LE: loop exit
PB: predicated region body
PF: predicated region fallthrough
CT: control target
= control target key end

     0   :  { %7 = vsyncpa [#allocation3], 0  ;;  %s889_s0 = inlined_call_operand.hbm [shape: f32[16,128], index: 0, kind: input, shape index: {}]   ;;  %s890_s1 = inlined_call_operand.hbm [shape: f32[16,128], index: 1, kind: input, shape index: {}]   ;;  %s891_s2 = inlined_call_operand.hbm [shape: f32[16,128], index: 2, kind: output, shape index: {}]  }
   0x1   :  { %9 = vsyncpa [#allocation3 + $0x1], 0 }
   0x2   :  { %10 = vsyncpa [#allocation6], 0 }
   0x3   :  { %12 = vsyncpa [#allocation6 + $0x1], 0 }
   0x4   :  { %13 = vsyncpa [#allocation4], 0 }
   0x5   :  { %15 = vsyncpa [#allocation4 + $0x1], 0  ;;  %s710_s9 = smov 0   ;;  %s712_s10 = smov 0  }
   0x6   :  { %s714_s11 = smov 0   ;;  %s716_s12 = smov 0  }
   0x7   :  { %s718_s13 = smov 0   ;;  %s720_s14 = smov 0  }
   0x8   :  { %s722_s15 = smov 0   ;;  %s724_s16 = smov 0  }
   0x9 LB: > { %s406_s17 = sadd.s32 4294967295, %s687_s16   ;;  %s407_s18 = sadd.s32 4294967294, %s687_s16   ;;  %s687_s16 = sphi %s724_s16, %s21_s16   ;;  %s683_s15 = sphi %s722_s15, %s910_s15   ;;  %s679_s14 = sphi %s720_s14, %s909_s14   ;;  %s675_s13 = sphi %s718_s13, %s879_s13   ;;  %s671_s12 = sphi %s716_s12, %s908_s12   ;;  %s667_s11 = sphi %s714_s11, %s907_s11   ;;  %s663_s10 = sphi %s712_s10, %s906_s10   ;;  %s659_s9 = sphi %s710_s9, %s905_s9  }
   0xa   : > { %s33_s19 = sadd.s32 1, %s683_s15  ;;  %p656_p1 = scmp.ne.s32.totalorder %s675_s13, 0 }
   0xb   : > { %p35_p0 = scmp.ge.s32.totalorder %s33_s19, 2  ;;  %p54_p2 = scmp.eq.s32.totalorder %s687_s16, 0 }
   0xc   : > { %p59_p3 = scmp.ne.s32.totalorder %s675_s13, %s671_s12  ;;  %p60_p5 = scmp.eq.s32.totalorder %s406_s17, 0 }
   0xd   : > { %s912_s19 = smov (%p35_p0, %s33_s19), 0  ;;  %p756_p4 = por %p656_p1, %p54_p2 }
   0xe   : > { %p760_p6 = por %p60_p5, %p59_p3  ;;  %s101_s22 = ssub.s32 %s683_s15, %s912_s19 }
   0xf   : > { %p102_p7 = scmp.eq.s32.totalorder %s101_s22, 0  ;;  %s104_s23 = sadd.s32 1, %s667_s11 }
  0x10   : > { %s895_s21 = scalar_select %p760_p6, 1, 0 }
  0x11   : > { %s768_s24 = scalar_select %p102_p7, %s667_s11, %s104_s23  }
  0x12   : > { %p114_p8 = scmp.ne.s32.totalorder %s667_s11, %s663_s10  ;;  %p115_p9 = scmp.eq.s32.totalorder %s406_s17, 1 }
  0x13   : > { %p120_p10 = scmp.ne.s32.totalorder %s663_s10, %s659_s9  ;;  %p121_p11 = scmp.eq.s32.totalorder %s407_s18, 1 }
  0x14   : > { %p774_p12 = por %p115_p9, %p114_p8  ;;  %p444_p1 = scmp.lt.s32.totalorder %s687_s16, 2 }
  0x15   : > { %p779_p0 = por %p121_p11, %p120_p10  ;;  %s689_s27 = smov [#allocation2]  }
  0x16   : > { %s896_s25 = scalar_select %p774_p12, 1, 0 }
  0x17   : > { %s897_s26 = scalar_select %p779_p0, 1, 0 }
  0x18   : > { %s155_s28 = sshll.u32 %s689_s27, 4  ;;  %p786_p2 = pnand %p444_p1, %p756_p4  ;;  %s156_s28 = int_to_ptr.vmem [resolvable:$true] %s155_s28 }
  0x19   : > { %s526_s4 = scalar_lea.hbm %s889_s0, 256 }
  0x1a   : > { %p527_p3 = scmp.ne.s32.totalorder %s889_s0, %s526_s4  ;;  %p528_p5 = pneg %p786_p2 }
  0x1b   : > { %p533_p8 = scmp.lt.s32.totalorder %s526_s4, %s526_s4 }
  0x1c   : > { %p529_p7 = pnand %p528_p5, %p527_p3 }
  0x1e   : > { %p530_p4 = pneg %p529_p7 }
  0x20   : > { %p535_p9 = pnand %p533_p8, %p530_p4 }
  0x22   : > { %538 = shalt.err (!%p535_p9)
}
  0x23   : > { %s539_s7 = scalar_lea.vmem %s156_s28, 256  ;;  %s546_s8 = scalar_lea.vmem %s156_s28, 512 }
  0x24   : > { %p540_p10 = scmp.ne.s32.totalorder %s156_s28, %s539_s7  ;;  %p547_p13 = scmp.lt.s32.totalorder %s156_s28, %s156_s28 }
  0x25   : > { %p548_p0 = scmp.lt.s32.totalorder %s546_s8, %s539_s7 }
  0x26   : > { %p542_p11 = pnand %p540_p10, %p528_p5 }
  0x27   : > { %p549_p12 = por %p548_p0, %p547_p13 }
  0x28   : > { %p543_p1 = pneg %p542_p11 }
  0x2a   : > { %p550_p6 = pnand %p549_p12, %p543_p1 }
  0x2c   : > { %553 = shalt.err (!%p550_p6)
}
  0x2d   : > { %s690_s12 = smov 128   ;;  %s691_s17 = smov 8  }
  0x2e   : > { %436 = dma.hbm_to_vmem [thread:$0]  (!%p786_p2), %s889_s0, 256, %s156_s28, [#allocation3], %s690_s12, %s690_s12, %s691_s17  }
  0x2f   : > { %p416_p3 = scmp.ge.s32.totalorder %s687_s16, 1  ;;  %p187_p7 = scmp.lt.s32.totalorder %s687_s16, 3 }
  0x30   : > { %s692_s23 = smov [#allocation5]   ;;  %s554_s4 = scalar_lea.hbm %s890_s1, 256 }
  0x31   : > { %p811_p4 = pnand %p416_p3, %p187_p7  ;;  %s179_s27 = sshll.u32 %s692_s23, 4  ;;  %s180_s27 = int_to_ptr.vmem [resolvable:$true] %s179_s27 }
  0x32   : > { %p555_p6 = scmp.ne.s32.totalorder %s890_s1, %s554_s4  ;;  %p561_p0 = scmp.lt.s32.totalorder %s554_s4, %s554_s4 }
  0x33   : > { %s899_s22 = scalar_select %p811_p4, 1, 0 }
  0x34   : > { %p557_p12 = pnand %p555_p6, %p528_p5 }
  0x36   : > { %p558_p13 = pneg %p557_p12 }
  0x38   : > { %p563_p8 = pnand %p561_p0, %p558_p13 }
  0x3a   : > { %566 = shalt.err (!%p563_p8)
}
  0x3b   : > { %s567_s28 = scalar_lea.vmem %s180_s27, 256  ;;  %s574_s7 = scalar_lea.vmem %s180_s27, 512 }
  0x3c   : > { %p568_p9 = scmp.ne.s32.totalorder %s180_s27, %s567_s28  ;;  %p575_p1 = scmp.lt.s32.totalorder %s180_s27, %s180_s27 }
  0x3d   : > { %p576_p3 = scmp.lt.s32.totalorder %s574_s7, %s567_s28 }
  0x3e   : > { %p570_p10 = pnand %p568_p9, %p528_p5 }
  0x3f   : > { %p577_p7 = por %p576_p3, %p575_p1 }
  0x40   : > { %p571_p11 = pneg %p570_p10 }
  0x42   : > { %p578_p4 = pnand %p577_p7, %p571_p11 }
  0x44   : > { %581 = shalt.err (!%p578_p4)
}
  0x45   : > { %439 = dma.hbm_to_vmem [thread:$0]  (!%p786_p2), %s890_s1, 256, %s180_s27, [#allocation6], %s690_s12, %s690_s12, %s691_s17  }
  0x46   : > { %p900_p6 = scmp.ne.s32.totalorder %s899_s22, 0 }
  0x47   : > { %s193_s20 = sand.u32 (!%p900_p6), 1, %s675_s13   ;;  %p901_p5 = scmp.ne.s32.totalorder (!%p900_p6), %s895_s21, 0 }
  0x48   : > { %191 = sbr.rel (%p900_p6) target bundleno = 123 (0x7b), region = 28  ;;  %s417_s23 = sshll.u32 (!%p900_p6), %s193_s20, 4 }
  0x49   : > { %s194_s30 = scalar_lea.sflag (!%p900_p6), [#allocation3], %s193_s20  ;;  %s197_s3 = scalar_lea.vmem (!%p900_p6), [#allocation2], %s417_s23 }
  0x4d   : > { %645 = dma.done.wait (%p901_p5), %s194_s30, 256  }
  0x4e   : > { %647 = vsyncadd (%p901_p5), %s194_s30, 4294967040  ;;  %s203_s29 = scalar_lea.sflag [#allocation6], %s193_s20  ;;  %s206_s4 = scalar_lea.vmem [#allocation5], %s417_s23 }
  0x4f   : > { %649 = dma.done.wait (%p901_p5), %s203_s29, 256  }
  0x50   : > { %651 = vsyncadd (%p901_p5), %s203_s29, 4294967040  ;;  %v264_v0 = vlaneseq  ;;  %v245_v1 = vld [vmem:[%s197_s3] sm:$0xff]  ;;  %v246_v2 = vld [vmem:[%s197_s3 + $0x8] sm:$0xff]  ;;  %s420_s12 = sshll.u32 %s679_s14, 4  ;;  %s229_s21 = sand.u32 1, %s663_s10   ;;  %vm693_vm4 = vmmov 1  }
  0x51   : > { %v247_v3 = vld [vmem:[%s206_s4] sm:$0xff]  ;;  %v248_v4 = vld [vmem:[%s206_s4 + $0x8] sm:$0xff]  ;;  %v253_v5 = vand.u32 2147483647, %v245_v1  ;;  %v254_v6 = vand.u32 2147483647, %v246_v2  ;;  %v270_v13 = vstv %s420_s12 }
  0x52   : > { %v255_v7 = vand.u32 2147483647, %v247_v3  ;;  %v256_v8 = vand.u32 2147483647, %v248_v4  ;;  %v265_v9 = vshrl.u32 %v264_v0, 7  ;;  %v249_v16 = vsub.f32 %v245_v1, %v247_v3  ;;  %s419_s17 = sshll.u32 %s229_s21, 3 }
  0x53   : > { %v250_v17 = vsub.f32 %v246_v2, %v248_v4  ;;  %v268_v18 = vand.u32 127, %v264_v0  ;;  %s422_s22 = sshll.u32 %s679_s14, 7  ;;  %s231_s27 = scalar_lea.vmem [#allocation7], %s419_s17 }
  0x54   : > { %v257_v10 = vadd.f32 %v255_v7, %v253_v5  ;;  %v258_v11 = vadd.f32 %v256_v8, %v254_v6  ;;  %v266_v12 = vadd.s32 8, %v265_v9  ;;  %v271_v14 = vadd.s32 %v270_v13, %v265_v9  ;;  %s305_s5 = sshll.u32 %s231_s27, 4  ;;  %s303_s7 = scalar_lea.hbm %s891_s2, %s422_s22  ;;  %s306_s5 = int_to_ptr.vmem [resolvable:$true] %s305_s5 }
  0x55   : > { %v251_v21 = vand.u32 2147483647, %v249_v16  ;;  %v252_v22 = vand.u32 2147483647, %v250_v17  ;;  %s292_s8 = scalar_lea.sflag [#allocation4], %s229_s21  ;;  %s582_s18 = scalar_lea.vmem %s306_s5, 128 }
  0x56   : > { %522 = vrcp.f32 %v257_v10  ;;  %v272_v15 = vadd.s32 %v270_v13, %v266_v12  ;;  %v273_v19 = vmul.u32 128, %v271_v14  ;;  %p583_p2 = scmp.ne.s32.totalorder %s306_s5, %s582_s18  ;;  %p902_p4 = scmp.ne.s32.totalorder %s896_s25, 0 }
  0x57   : > { %524 = vrcp.f32 %v258_v11  ;;  %s694_s20 = smov [#allocation7]  }
  0x58   : > { %v274_v20 = vmul.u32 128, %v272_v15  ;;  %v275_v23 = vadd.s32 %v273_v19, %v268_v18  ;;  %p584_p12 = pnand %p583_p2, %p902_p4  ;;  %s586_s23 = sshll.u32 %s694_s20, 4  ;;  %s587_s23 = int_to_ptr.vmem [resolvable:$false] %s586_s23 }
  0x59   : > { %s588_s30 = scalar_lea.vmem %s587_s23, 256  ;;  %p589_p0 = scmp.lt.s32.totalorder %s306_s5, %s587_s23 }
  0x5a   : > { %v276_v25 = vadd.s32 %v274_v20, %v268_v18  ;;  %vm277_vm0 = vcmp.lt.s32.totalorder %v275_v23, 2048  ;;  %p585_p13 = pneg %p584_p12  ;;  %p590_p8 = scmp.lt.s32.totalorder %s588_s30, %s582_s18 }
  0x5c   : > { %vm278_vm2 = vcmp.lt.s32.totalorder %v276_v25, 2048  ;;  %p591_p9 = por %p590_p8, %p589_p0 }
  0x5e   : > { %p592_p10 = pnand %p591_p9, %p585_p13 }
  0x63   : > { %v523_v24 = vpop.eup %522 }
  0x64   : > { %v525_v26 = vpop.eup %524  ;;  %v260_v27 = vmul.f32 %v523_v24, %v251_v21 }
  0x65   : > { %v262_v28 = vmul.f32 %v525_v26, %v252_v22 }
  0x66   : > { %vm279_vm1 = vweird.f32 %v260_v27 }
  0x67   : > { %vm280_vm3 = vweird.f32 %v262_v28  ;;  %vm281_vm5 = vmxor %vm279_vm1, %vm693_vm4 }
  0x68   : > { %vm282_vm6 = vmxor %vm280_vm3, %vm693_vm4 }
  0x69   : > { %vm283_vm7 = vmand %vm281_vm5, %vm277_vm0 }
  0x6a   : > { %vm284_vm8 = vmand %vm282_vm6, %vm278_vm2  ;;  %v285_v29 = vsel %vm283_vm7, %v260_v27, 0.0 }
  0x6b   : > { %v286_v30 = vsel %vm284_vm8, %v262_v28, 0.0 }
  0x6c   : > { %v288_v31 = vadd.f32 %v286_v30, %v285_v29 }
  0x6e   : > { %290 = vst [vmem:[%s231_s27] sm:$0xff] %v288_v31 }
  0x6f   : > { %595 = shalt.err (!%p592_p10)
}
  0x70   : > { %s596_s14 = scalar_lea.hbm %s303_s7, 128  ;;  %s600_s4 = scalar_lea.hbm %s891_s2, 256 }
  0x71   : > { %p597_p11 = scmp.ne.s32.totalorder %s303_s7, %s596_s14  ;;  %p601_p7 = scmp.lt.s32.totalorder %s303_s7, %s891_s2 }
  0x72   : > { %p602_p6 = scmp.lt.s32.totalorder %s600_s4, %s596_s14 }
  0x73   : > { %p598_p1 = pnand %p597_p11, %p902_p4 }
  0x74   : > { %p603_p5 = por %p602_p6, %p601_p7 }
  0x75   : > { %p599_p3 = pneg %p598_p1 }
  0x77   : > { %p604_p2 = pnand %p603_p5, %p599_p3 }
  0x79   : > { %607 = shalt.err (!%p604_p2)
}
  0x7a   : > { %431 = dma.vmem_to_hbm [thread:$0]  (%p902_p4), %s306_s5, 128, %s303_s7, %s292_s8  }
  0x7b PF: > { %s317_s17 = sand.u32 1, %s659_s9   ;;  %p903_p12 = scmp.ne.s32.totalorder %s897_s26, 0 }
  0x7c   : > { %p904_p13 = scmp.ge.s32.totalorder %s687_s16, 2  ;;  %s318_s22 = scalar_lea.sflag [#allocation4], %s317_s17 }
  0x7e   : > { %p441_p0 = pnand %p904_p13, %p903_p12 }
  0x80   : > { %p442_p8 = pneg %p441_p0 }
  0x82   : > { %653 = dma.done.wait (%p442_p8), %s318_s22, 128  }
  0x83   : > { %655 = vsyncadd (%p442_p8), %s318_s22, 4294967168  ;;  %s21_s16 = sadd.s32 1, %s687_s16   ;;  %s905_s9 = smov %s663_s10 }
  0x84   : > { %p18_p9 = scmp.ge.s32.totalorder %s21_s16, 4   ;;  %s906_s10 = smov %s667_s11 }
  0x85   : > { %s907_s11 = smov %s768_s24  ;;  %s908_s12 = smov %s675_s13 }
  0x86   : > { %s879_s13 = smov 0   ;;  %s909_s14 = smov %s683_s15 }
  0x87   : > { %s910_s15 = smov %s912_s19  ;;  %20 = sbr.rel (!%p18_p9) target bundleno = 9 (0x9), region = 90 }
  0x8c   :  { %323 = vsyncpa [#allocation3], 1 }
  0x8d   :  { %325 = vsyncpa [#allocation3 + $0x1], 1 }
  0x8e   :  { %326 = vsyncpa [#allocation6], 1 }
  0x8f   :  { %328 = vsyncpa [#allocation6 + $0x1], 1 }
  0x90   :  { %329 = vsyncpa [#allocation4], 1 }
  0x91   :  { %331 = vsyncpa [#allocation4 + $0x1], 1 }

</bundles_post_ra>
